<compile_context>
chip_gen: v5e
topology: v5e:2x2
jax: 0.10.0
libtpu: 0.0.40
codegen_flags: <defaults>
</compile_context>

<pallas_src>
import functools
import math

import jax
import jax.numpy as jnp
from jax.experimental import pallas as pl
from jax.experimental.pallas import tpu as pltpu

# Keep the XLA reference at full f32 matmul precision so it matches the in-kernel MXU math.
jax.config.update("jax_default_matmul_precision", "highest")


def _pick_tile(n, target, align):
    """Largest multiple of `align` that divides n and is <= target; falls back to n (full dim)."""
    if n <= target:
        return n
    t = (target // align) * align
    while t >= align:
        if n % t == 0:
            return t
        t -= align
    return n


# ---------------------------------------------------------------------------
# Kernel A: fused QKV projection   x (tm, D) @ W_qkv (D, 3D) + b_qkv -> q/k/v (tm, D) each
# ---------------------------------------------------------------------------
def _qkv_proj_kernel(x_ref, w_ref, b_ref, q_ref, k_ref, v_ref, *, D):
    y = jnp.dot(x_ref[...], w_ref[...], preferred_element_type=jnp.float32)
    y = (y + b_ref[...]).astype(q_ref.dtype)          # (tm, 3D)
    q_ref[...] = y[:, 0 * D:1 * D]
    k_ref[...] = y[:, 1 * D:2 * D]
    v_ref[...] = y[:, 2 * D:3 * D]


# ---------------------------------------------------------------------------
# Kernel B: flash-style multi-head attention core
#   grid = (B, q_tiles, kv_tiles); heads are sliced / merged in-kernel (lane slices of D).
# ---------------------------------------------------------------------------
def _flash_attn_kernel(*refs, H, dh, scale, with_head_mask):
    if with_head_mask:
        q_ref, k_ref, v_ref, bias_ref, hm_ref, out_ref, m_sc, l_sc, acc_sc = refs
    else:
        q_ref, k_ref, v_ref, bias_ref, out_ref, m_sc, l_sc, acc_sc = refs
        hm_ref = None

    ki = pl.program_id(2)
    nk = pl.num_programs(2)

    @pl.when(ki == 0)
    def _init():
        m_sc[...] = jnp.full_like(m_sc, -jnp.inf)
        l_sc[...] = jnp.zeros_like(l_sc)
        acc_sc[...] = jnp.zeros_like(acc_sc)

    # Scale folded into q once: touches (tq, D), not (tq, tk) per head.
    q_all = q_ref[0].astype(jnp.float32) * scale       # (tq, D)
    k_all = k_ref[0]                                    # (tk, D)
    v_all = v_ref[0]                                    # (tk, D)
    bias = bias_ref[0].astype(jnp.float32)              # (tq, tk) or (1, tk)

    for h in range(H):
        lo, hi = h * dh, (h + 1) * dh
        q_h = q_all[:, lo:hi]                            # (tq, dh)
        k_h = k_all[:, lo:hi].astype(jnp.float32)        # (tk, dh)
        v_h = v_all[:, lo:hi]                            # (tk, dh)

        # scores = q @ k^T  (contraction on dh, keys on the lane axis)
        s = jax.lax.dot_general(q_h, k_h, (((1,), (1,)), ((), ())),
                                preferred_element_type=jnp.float32)   # (tq, tk)
        s = s + bias                                     # single fused (dist + mask) add

        m_prev = m_sc[h]                                 # (tq, 1)
        l_prev = l_sc[h]                                 # (tq, 1)
        m_new = jnp.maximum(m_prev, jnp.max(s, axis=-1, keepdims=True))
        alpha = jnp.exp(m_prev - m_new)                  # (tq, 1)
        p = jnp.exp(s - m_new)                           # (tq, tk)
        l_sc[h] = alpha * l_prev + jnp.sum(p, axis=-1, keepdims=True)
        m_sc[h] = m_new

        pv = jnp.dot(p.astype(v_h.dtype), v_h, preferred_element_type=jnp.float32)  # (tq, dh)
        acc_sc[:, lo:hi] = alpha * acc_sc[:, lo:hi] + pv

    @pl.when(ki == nk - 1)
    def _finalize():
        acc = acc_sc[...]                                # (tq, D)
        cols = []
        for h in range(H):
            lo, hi = h * dh, (h + 1) * dh
            ctx_h = acc[:, lo:hi] / l_sc[h]              # exact divide (correctness)
            if with_head_mask:
                ctx_h = ctx_h * hm_ref[h]                # per-head scalar from SMEM
            cols.append(ctx_h)
        # heads already merged in order -> one lane-dense (tq, D) store
        out_ref[0] = jnp.concatenate(cols, axis=-1).astype(out_ref.dtype)


# ---------------------------------------------------------------------------
# Wrapper
# ---------------------------------------------------------------------------
def spatial_bert_self_attention(hidden_states, attention_mask, params, *,
                                num_attention_heads, distance_matrix=None, head_mask=None):
    B, S, D = hidden_states.shape
    H = num_attention_heads
    assert D % H == 0, "hidden_size must be a multiple of num_attention_heads"
    dh = D // H
    scale = 1.0 / math.sqrt(dh)
    dtype = hidden_states.dtype
    vmem_limit = 48 * 1024 * 1024   # safe on v5e/v6e (128 MiB) and v7x (64 MiB physical)

    # ---- Kernel A: fused QKV projection, M-tiled over B*S rows ----
    w_qkv = jnp.concatenate([params["w_q"], params["w_k"], params["w_v"]], axis=1)       # (D, 3D)
    b_qkv = jnp.concatenate([params["b_q"], params["b_k"], params["b_v"]]).reshape(1, 3 * D)

    M = B * S
    tm = _pick_tile(M, 256, 8)
    hidden2d = hidden_states.reshape(M, D)               # free row-major reshape

    q2d, k2d, v2d = pl.pallas_call(
        functools.partial(_qkv_proj_kernel, D=D),
        out_shape=tuple(jax.ShapeDtypeStruct((M, D), dtype) for _ in range(3)),
        grid=(M // tm,),
        in_specs=[
            pl.BlockSpec((tm, D), lambda i: (i, 0)),      # activation row tile
            pl.BlockSpec((D, 3 * D), lambda i: (0, 0)),   # fused QKV weight (resident)
            pl.BlockSpec((1, 3 * D), lambda i: (0, 0)),   # fused QKV bias
        ],
        out_specs=tuple(pl.BlockSpec((tm, D), lambda i: (i, 0)) for _ in range(3)),
        compiler_params=pltpu.CompilerParams(
            dimension_semantics=("parallel",),
            vmem_limit_bytes=vmem_limit),
    )(hidden2d, w_qkv, b_qkv)

    q = q2d.reshape(B, S, D)   # free reshapes, no transposes / head splits
    k = k2d.reshape(B, S, D)
    v = v2d.reshape(B, S, D)

    # ---- additive bias: attention_mask (per-key) pre-added into the distance bias ----
    if attention_mask.size != B * S:
        raise ValueError("only per-key additive attention masks of size B*S are supported")
    mask2d = attention_mask.reshape(B, S).astype(jnp.float32)

    tq = _pick_tile(S, 256, 8)
    tk = _pick_tile(S, 256, 128)
    n_q, n_k = S // tq, S // tk

    if distance_matrix is not None:
        bias = distance_matrix.astype(jnp.float32) + mask2d[:, None, :]     # (B, S, S)
        bias_spec = pl.BlockSpec((1, tq, tk), lambda b, qi, ki: (b, qi, ki))
    else:
        bias = mask2d[:, None, :]                                           # (B, 1, S)
        bias_spec = pl.BlockSpec((1, 1, tk), lambda b, qi, ki: (b, 0, ki))

    in_specs = [
        pl.BlockSpec((1, tq, D), lambda b, qi, ki: (b, qi, 0)),   # q tile
        pl.BlockSpec((1, tk, D), lambda b, qi, ki: (b, ki, 0)),   # k tile
        pl.BlockSpec((1, tk, D), lambda b, qi, ki: (b, ki, 0)),   # v tile
        bias_spec,
    ]
    inputs = [q, k, v, bias]
    with_head_mask = head_mask is not None
    if with_head_mask:
        in_specs.append(pl.BlockSpec(memory_space=pltpu.MemorySpace.SMEM))  # (H,) scalars
        inputs.append(jnp.asarray(head_mask, jnp.float32).reshape(H))

    context_layer = pl.pallas_call(
        functools.partial(_flash_attn_kernel, H=H, dh=dh, scale=scale,
                          with_head_mask=with_head_mask),
        out_shape=jax.ShapeDtypeStruct((B, S, D), dtype),
        grid=(B, n_q, n_k),
        in_specs=in_specs,
        out_specs=pl.BlockSpec((1, tq, D), lambda b, qi, ki: (b, qi, 0)),
        scratch_shapes=[
            pltpu.VMEM((H, tq, 1), jnp.float32),   # running max per head
            pltpu.VMEM((H, tq, 1), jnp.float32),   # running denom per head
            pltpu.VMEM((tq, D), jnp.float32),      # merged-head accumulator (lane-dense)
        ],
        compiler_params=pltpu.CompilerParams(
            dimension_semantics=("parallel", "parallel", "arbitrary"),
            vmem_limit_bytes=vmem_limit),
    )(*inputs)

    return context_layer   # already (B, S, D) with heads merged in-kernel


# ---------------------------------------------------------------------------
# Pure-JAX reference mirroring the PyTorch forward exactly (eval mode)
# ---------------------------------------------------------------------------
def _reference(hidden, attention_mask, params, num_heads, distance_matrix=None, head_mask=None):
    B, S, D = hidden.shape
    dh = D // num_heads

    def tfs(x):
        return x.reshape(B, S, num_heads, dh).transpose(0, 2, 1, 3)

    q = tfs(hidden @ params["w_q"] + params["b_q"])
    k = tfs(hidden @ params["w_k"] + params["b_k"])
    v = tfs(hidden @ params["w_v"] + params["b_v"])
    scores = jnp.einsum('bhqd,bhkd->bhqk', q, k) / math.sqrt(dh)
    if distance_matrix is not None:
        scores = scores + distance_matrix[:, None, :, :]
    scores = scores + attention_mask.reshape(B, 1, 1, S)
    probs = jax.nn.softmax(scores, axis=-1)
    if head_mask is not None:
        probs = probs * head_mask.reshape(1, num_heads, 1, 1)
    ctx = jnp.einsum('bhqk,bhkd->bhqd', probs, v)
    return ctx.transpose(0, 2, 1, 3).reshape(B, S, D)


if __name__ == "__main__":
    # Small shapes consistent with the module: batch=2, seq=8, hidden=32, heads=4 (head_dim=8)
    B, S, D, H = 2, 8, 32, 4

    key = jax.random.PRNGKey(0)
    ks = jax.random.split(key, 10)

    def init(k, shape, fan_in):
        return (jax.random.uniform(k, shape, jnp.float32, -1.0, 1.0)
                / jnp.sqrt(jnp.float32(fan_in)))

    params = {
        "w_q": init(ks[0], (D, D), D), "b_q": init(ks[1], (D,), D),
        "w_k": init(ks[2], (D, D), D), "b_k": init(ks[3], (D,), D),
        "w_v": init(ks[4], (D, D), D), "b_v": init(ks[5], (D,), D),
    }

    hidden = jax.random.normal(ks[6], (B, S, D), jnp.float32)

    # BERT-style additive attention mask (0 for valid tokens, -10000 for padding)
    lengths = jnp.array([S, 5])
    valid = (jnp.arange(S)[None, :] < lengths[:, None]).astype(jnp.float32)
    attention_mask = ((1.0 - valid) * -10000.0).reshape(B, 1, 1, S)

    # "Spatial" distance bias added to the attention scores
    distance_matrix = 0.1 * jax.random.normal(ks[7], (B, S, S), jnp.float32)

    out = spatial_bert_self_attention(
        hidden, attention_mask, params,
        num_attention_heads=H,
        distance_matrix=distance_matrix,
        head_mask=None)
    out = jax.block_until_ready(out)

    ref = _reference(hidden, attention_mask, params, H, distance_matrix, None)
    assert out.shape == (B, S, D)
    assert jnp.allclose(out, ref, atol=5e-5, rtol=5e-5), "mismatch vs reference"

    print("KERNEL_OK")
</pallas_src>

<mosaic_0001>
module attributes {stable_mosaic.version = 11 : i64} {
  func.func @_qkv_proj_kernel(%arg0: i32, %arg1: memref<16x32xf32, #tpu.memory_space<vmem>>, %arg2: memref<32x96xf32, #tpu.memory_space<vmem>>, %arg3: memref<1x96xf32, #tpu.memory_space<vmem>>, %arg4: memref<16x32xf32, #tpu.memory_space<vmem>>, %arg5: memref<16x32xf32, #tpu.memory_space<vmem>>, %arg6: memref<16x32xf32, #tpu.memory_space<vmem>>) attributes {dimension_semantics = [#tpu.dimension_semantics<parallel>], iteration_bounds = array<i64: 1>, scalar_prefetch = 0 : i64, scratch_operands = 0 : i64, tpu.core_type = #tpu.core_type<tc>, window_params = [{transform_indices = @transform_0, window_bounds = array<i64: 16, 32>}, {pipeline_mode = #tpu.pipeline_mode<synchronous>, transform_indices = @transform_1, window_bounds = array<i64: 32, 96>}, {pipeline_mode = #tpu.pipeline_mode<synchronous>, transform_indices = @transform_2, window_bounds = array<i64: 1, 96>}, {transform_indices = @transform_3, window_bounds = array<i64: 16, 32>}, {transform_indices = @transform_4, window_bounds = array<i64: 16, 32>}, {transform_indices = @transform_5, window_bounds = array<i64: 16, 32>}]} {
    %c0 = arith.constant 0 : index
    %c0_0 = arith.constant 0 : index
    %0 = vector.load %arg1[%c0, %c0_0] : memref<16x32xf32, #tpu.memory_space<vmem>>, vector<16x32xf32>
    %c0_1 = arith.constant 0 : index
    %c0_2 = arith.constant 0 : index
    %1 = vector.load %arg2[%c0_1, %c0_2] : memref<32x96xf32, #tpu.memory_space<vmem>>, vector<32x96xf32>
    %cst = arith.constant dense<0.000000e+00> : vector<16x96xf32>
    %2 = tpu.matmul %0, %1, %cst {dimension_numbers = #tpu.dot_dimension_numbers<[1], [0], [0], [1], [0, 0, 1, 1], [], []>, precision = #tpu.contract_precision<fp32>} : vector<16x32xf32>, vector<32x96xf32>, vector<16x96xf32> -> vector<16x96xf32>
    %c0_3 = arith.constant 0 : index
    %c0_4 = arith.constant 0 : index
    %3 = vector.load %arg3[%c0_3, %c0_4] : memref<1x96xf32, #tpu.memory_space<vmem>>, vector<1x96xf32>
    %4 = vector.broadcast %3 : vector<1x96xf32> to vector<16x96xf32>
    %5 = arith.addf %2, %4 : vector<16x96xf32>
    %6 = vector.extract_strided_slice %5 {offsets = [0, 0], sizes = [16, 32], strides = [1, 1]} : vector<16x96xf32> to vector<16x32xf32>
    %c0_5 = arith.constant 0 : index
    %c0_6 = arith.constant 0 : index
    %7 = vector.load %arg4[%c0_5, %c0_6] : memref<16x32xf32, #tpu.memory_space<vmem>>, vector<16x32xf32>
    tpu.vector_store %arg4[%c0_5, %c0_6], %6 {strides = array<i32>} : memref<16x32xf32, #tpu.memory_space<vmem>>, vector<16x32xf32>,
    %8 = vector.extract_strided_slice %5 {offsets = [0, 32], sizes = [16, 32], strides = [1, 1]} : vector<16x96xf32> to vector<16x32xf32>
    %c0_7 = arith.constant 0 : index
    %c0_8 = arith.constant 0 : index
    %9 = vector.load %arg5[%c0_7, %c0_8] : memref<16x32xf32, #tpu.memory_space<vmem>>, vector<16x32xf32>
    tpu.vector_store %arg5[%c0_7, %c0_8], %8 {strides = array<i32>} : memref<16x32xf32, #tpu.memory_space<vmem>>, vector<16x32xf32>,
    %10 = vector.extract_strided_slice %5 {offsets = [0, 64], sizes = [16, 32], strides = [1, 1]} : vector<16x96xf32> to vector<16x32xf32>
    %c0_9 = arith.constant 0 : index
    %c0_10 = arith.constant 0 : index
    %11 = vector.load %arg6[%c0_9, %c0_10] : memref<16x32xf32, #tpu.memory_space<vmem>>, vector<16x32xf32>
    tpu.vector_store %arg6[%c0_9, %c0_10], %10 {strides = array<i32>} : memref<16x32xf32, #tpu.memory_space<vmem>>, vector<16x32xf32>,
    return
  }
  func.func @transform_0(%arg0: i32) -> (i32, i32) {
    %c0_i32 = arith.constant 0 : i32
    %c0_i32_0 = arith.constant 0 : i32
    return %arg0, %c0_i32 : i32, i32
  }
  func.func @transform_1(%arg0: i32) -> (i32, i32) {
    %c0_i32 = arith.constant 0 : i32
    %c0_i32_0 = arith.constant 0 : i32
    %c0_i32_1 = arith.constant 0 : i32
    return %c0_i32, %c0_i32_0 : i32, i32
  }
  func.func @transform_2(%arg0: i32) -> (i32, i32) {
    %c0_i32 = arith.constant 0 : i32
    %c0_i32_0 = arith.constant 0 : i32
    %c0_i32_1 = arith.constant 0 : i32
    return %c0_i32, %c0_i32_0 : i32, i32
  }
  func.func @transform_3(%arg0: i32) -> (i32, i32) {
    %c0_i32 = arith.constant 0 : i32
    %c0_i32_0 = arith.constant 0 : i32
    return %arg0, %c0_i32 : i32, i32
  }
  func.func @transform_4(%arg0: i32) -> (i32, i32) {
    %c0_i32 = arith.constant 0 : i32
    %c0_i32_0 = arith.constant 0 : i32
    return %arg0, %c0_i32 : i32, i32
  }
  func.func @transform_5(%arg0: i32) -> (i32, i32) {
    %c0_i32 = arith.constant 0 : i32
    %c0_i32_0 = arith.constant 0 : i32
    return %arg0, %c0_i32 : i32, i32
  }
}

</mosaic_0001>

<bundles_post_ra>
// kernel: tpu_custom_call.1
= control target key start
LH: loop header
LB: loop body
LE: loop exit
PB: predicated region body
PF: predicated region fallthrough
CT: control target
= control target key end

     0   :  { %11 = vsyncpa [#allocation3], 0  ;;  %s612_s0 = inlined_call_operand.hbm [shape: f32[16,32], index: 0, kind: input, shape index: {}]   ;;  %s613_s1 = inlined_call_operand.hbm [shape: f32[32,96], index: 1, kind: input, shape index: {}]   ;;  %s614_s2 = inlined_call_operand.vmem [shape: f32[1,96], index: 2, kind: input, shape index: {}]   ;;  %s615_s3 = inlined_call_operand.hbm [shape: f32[16,32], index: 3, kind: output, shape index: {0}]   ;;  %s616_s4 = inlined_call_operand.hbm [shape: f32[16,32], index: 4, kind: output, shape index: {1}]   ;;  %s617_s5 = inlined_call_operand.hbm [shape: f32[16,32], index: 5, kind: output, shape index: {2}]  }
   0x1   :  { %12 = vsyncpa [#allocation6], 0 }
   0x2   :  { %13 = vsyncpa [#allocation4], 0 }
   0x3   :  { %14 = vsyncpa [#allocation9], 0  ;;  %s19_s20 = sshll.u32 %s612_s0, 4  ;;  %s505_s21 = smov [#allocation2]   ;;  %s20_s20 = int_to_ptr.hbm [resolvable:$true] %s19_s20 }
   0x4   :  { %s21_s22 = sshll.u32 %s505_s21, 4  ;;  %s32_s25 = sshll.u32 %s613_s1, 4  ;;  %s22_s22 = int_to_ptr.vmem [resolvable:$true] %s21_s22  ;;  %s33_s25 = int_to_ptr.hbm [resolvable:$true] %s32_s25 }
   0x5   :  { %s506_s26 = smov 128   ;;  %s507_s27 = smov 8  }
   0x6   :  { %27 = dma.hbm_to_vmem [thread:$0]  %s20_s20, 256, %s22_s22, [#allocation3], %s506_s26, %s506_s26, %s507_s27  }
   0x7   :  { %s508_s28 = smov [#allocation5]  }
   0x8   :  { %s34_s29 = sshll.u32 %s508_s28, 4  ;;  %s35_s29 = int_to_ptr.vmem [resolvable:$true] %s34_s29 }
   0x9   :  { %40 = dma.hbm_to_vmem [thread:$0]  %s33_s25, 512, %s35_s29, [#allocation6], %s506_s26, %s506_s26, %s507_s27  }
   0xa   :  { %497 = dma.done.wait [#allocation3], 256  }
   0xb   :  { %498 = vsyncadd [#allocation3], 4294967040 }
   0xc   :  { %499 = dma.done.wait [#allocation6], 512  }
   0xd   :  { %500 = vsyncadd [#allocation6], 4294966784  ;;  %vm61_vm0 = vcmask 261120   ;;  %v56_v0 = vld [vmem:[#allocation5 + $0x18] sm:$0xff]  ;;  %v55_v1 = vld [vmem:[#allocation5 + $0x10] sm:$0xff]  ;;  %s510_s30 = smov 96  }
   0xe   :  { %v54_v2 = vld [vmem:[#allocation5 + $0x8] sm:$0xff]  ;;  %v80_v3 = vand.u32 4294901760, %v56_v0  ;;  %v556_v4 = vand.u32 4294901760, %v55_v1  ;;  %v53_v6 = vld [vmem:[#allocation5] sm:$0xff]  ;;  %v52_v7 = vld [vmem:[#allocation2 + $0x8] sm:$0xff]  ;;  %s511_s6 = smov [#allocation7]  }
   0xf   :  { %v558_v5 = vand.u32 4294901760, %v54_v2  ;;  %v51_v8 = vld [vmem:[#allocation2] sm:$0xff]  ;;  %v560_v9 = vand.u32 4294901760, %v53_v6  ;;  %v66_v10 = vsel %vm61_vm0, %v52_v7, 0  ;;  %s308_s7 = sshll.u32 %s511_s6, 4  ;;  %s310_s10 = sshll.u32 %s615_s3, 4  ;;  %s309_s7 = int_to_ptr.vmem [resolvable:$true] %s308_s7  ;;  %s311_s10 = int_to_ptr.hbm [resolvable:$true] %s310_s10 }
  0x10   :  { %v63_v11 = vsel %vm61_vm0, %v51_v8, 0  ;;  %359 = vmatpush.msra.mxu2 %v80_v3  ;;  %v118_v12 = vsub.f32 %v56_v0, %v80_v3  ;;  %v564_v13 = vand.u32 4294901760, %v66_v10  ;;  %v124_v14 = vsub.f32 %v55_v1, %v556_v4  ;;  %81 = vmatpush.msra.mxu0 %v80_v3  ;;  %v376_v39 = vld [vmem:[%s614_s2] ss:$0 sm:$0xff]  ;;  %s509_s2 = smov 64   ;;  %s512_s11 = smov [#allocation8]  }
  0x11   :  { %v130_v15 = vsub.f32 %v54_v2, %v558_v5  ;;  %v136_v16 = vsub.f32 %v53_v6, %v560_v9  ;;  %v88_v17 = vand.u32 4294901760, %v63_v11  ;;  %s321_s3 = sshll.u32 %s512_s11, 4  ;;  %s323_s14 = sshll.u32 %s616_s4, 4  ;;  %s322_s3 = int_to_ptr.vmem [resolvable:$true] %s321_s3  ;;  %s324_s14 = int_to_ptr.hbm [resolvable:$true] %s323_s14 }
  0x12   :  { %360 = vmatpush.msra.mxu2 %v556_v4  ;;  %v119_v18 = vand.u32 4294901760, %v118_v12  ;;  %v97_v19 = vsub.f32 %v66_v10, %v564_v13  ;;  %v125_v20 = vand.u32 4294901760, %v124_v14  ;;  %83 = vmatpush.msra.mxu0 %v556_v4  ;;  %s513_s15 = smov [#allocation10]   ;;  %s336_s19 = sshll.u32 %s617_s5, 4  ;;  %s337_s19 = int_to_ptr.hbm [resolvable:$true] %s336_s19 }
  0x13   :  { %v131_v21 = vand.u32 4294901760, %v130_v15  ;;  %v137_v22 = vand.u32 4294901760, %v136_v16  ;;  %v89_v23 = vsub.f32 %v63_v11, %v88_v17  ;;  %s334_s16 = sshll.u32 %s513_s15, 4  ;;  %s335_s16 = int_to_ptr.vmem [resolvable:$true] %s334_s16 }
  0x14   :  { %361 = vmatpush.msra.mxu2 %v558_v5  ;;  %v120_v24 = vsub.f32 %v118_v12, %v119_v18  ;;  %v98_v25 = vand.u32 4294901760, %v97_v19  ;;  %v126_v26 = vsub.f32 %v124_v14, %v125_v20  ;;  %85 = vmatpush.msra.mxu0 %v558_v5 }
  0x15   :  { %v132_v27 = vsub.f32 %v130_v15, %v131_v21  ;;  %v90_v28 = vand.u32 4294901760, %v89_v23  ;;  %v138_v32 = vsub.f32 %v136_v16, %v137_v22 }
  0x16   :  { %362 = vmatpush.msra.mxu2 %v560_v9  ;;  %v121_v29 = vand.u32 4294901760, %v120_v24  ;;  %v99_v30 = vsub.f32 %v97_v19, %v98_v25  ;;  %v127_v31 = vand.u32 4294901760, %v126_v26  ;;  %87 = vmatpush.msra.mxu0 %v560_v9 }
  0x17   :  { %v91_v33 = vsub.f32 %v89_v23, %v90_v28  ;;  %v133_v35 = vand.u32 4294901760, %v132_v27  ;;  %v139_v37 = vand.u32 4294901760, %v138_v32 }
  0x18   :  { %164 = vmatpush.msrb.mxu2 %v118_v12  ;;  %233 = vmatpush.msrb.mxu0 %v119_v18  ;;  %v100_v34 = vand.u32 4294901760, %v99_v30 }
  0x19   :  { %363 = vmatpush.msra.mxu3 %v121_v29  ;;  %122 = vmatpush.msra.mxu1 %v121_v29  ;;  %v92_v36 = vand.u32 4294901760, %v91_v33 }
  0x1a   :  { %167 = vmatpush.msrb.mxu2 %v124_v14  ;;  %237 = vmatpush.msrb.mxu0 %v125_v20 }
  0x1b   :  { %101 = vmatmul.f32.vlgmr.msra.gmra.mxu2 %v100_v34  ;;  %364 = vmatpush.msra.mxu3 %v127_v31 }
  0x1c   :  { %170 = vmatpush.msrb.mxu2 %v130_v15  ;;  %128 = vmatpush.msra.mxu1 %v127_v31 }
  0x1d   :  { %365 = vmatpush.msra.mxu3 %v133_v35  ;;  %93 = vmatmul.f32.vlgmr.msra.gmra.mxu0 %v92_v36 }
  0x1e   :  { %173 = vmatpush.msrb.mxu2 %v136_v16  ;;  %134 = vmatpush.msra.mxu1 %v133_v35 }
  0x1f   :  { %366 = vmatpush.msra.mxu3 %v139_v37  ;;  %241 = vmatpush.msrb.mxu0 %v131_v21 }
  0x20   :  { %146 = vmatmul.f32.vlgmr.msra.gmra.mxu3 %v564_v13  ;;  %140 = vmatpush.msra.mxu1 %v139_v37 }
  0x21   :  { %198 = vmatpush.msrb.mxu3 %v80_v3  ;;  %142 = vmatmul.f32.vlgmr.msra.gmra.mxu1 %v88_v17 }
  0x22   :  { %268 = vmatpush.msrb.mxu1 %v80_v3  ;;  %245 = vmatpush.msrb.mxu0 %v137_v22 }
  0x23   :  { %176 = vmatmul.f32.vlgmr.msrb.gmra.mxu2 %v89_v23  ;;  %200 = vmatpush.msrb.mxu3 %v556_v4 }
  0x24   :  { %270 = vmatpush.msrb.mxu1 %v556_v4 }
  0x25   :  { %202 = vmatpush.msrb.mxu3 %v558_v5  ;;  %247 = vmatmul.f32.vlgmr.msrb.gmra.mxu0 %v88_v17 }
  0x26   :  { %272 = vmatpush.msrb.mxu1 %v558_v5 }
  0x27   :  { %204 = vmatpush.msrb.mxu3 %v560_v9 }
  0x28   :  { %208 = vmatmul.f32.vlgmr.msrb.gmra.mxu3 %v90_v28  ;;  %274 = vmatpush.msrb.mxu1 %v560_v9 }
  0x29   :  { %276 = vmatmul.f32.vlgmr.msrb.gmra.mxu1 %v88_v17 }
  0x2b   :  { %181 = vmatmul.f32.gmra.mxu2 %v97_v19 }
  0x2d   :  { %251 = vmatmul.f32.gmra.mxu0 %v564_v13 }
  0x30   :  { %214 = vmatmul.f32.gmra.mxu3 %v98_v25 }
  0x31   :  { %280 = vmatmul.f32.gmra.mxu1 %v564_v13 }
  0x9a   :  { %v94_v38 = vpop.f32.mrf.mxu0 }
  0x9b   :  { %v95_v41 = vadd.f32 %v376_v39, %v94_v38 }
  0x9e   :  { %v102_v40 = vpop.f32.mrf.mxu2  ;;  %v143_v42 = vpop.f32.mrf.mxu1 }
  0x9f   :  { %v144_v44 = vadd.f32 %v143_v42, %v95_v41  ;;  %v103_v50 = vadd.f32 %v376_v39, %v102_v40 }
  0xa2   :  { %v248_v47 = vpop.f32.mrf.mxu0 }
  0xa3   :  { %v147_v43 = vpop.f32.mrf.mxu3 }
  0xa4   :  { %v148_v54 = vadd.f32 %v147_v43, %v103_v50 }
  0xa6   :  { %v177_v45 = vpop.f32.mrf.mxu2  ;;  %v277_v49 = vpop.f32.mrf.mxu1 }
  0xa7   :  { %v178_v46 = vadd.f32 %v177_v45, %v144_v44 }
  0xaa   :  { %v252_v58 = vpop.f32.mrf.mxu0 }
  0xab   :  { %v209_v48 = vpop.f32.mrf.mxu3 }
  0xac   :  { %v210_v51 = vadd.f32 %v209_v48, %v178_v46 }
  0xae   :  { %v249_v52 = vadd.f32 %v248_v47, %v210_v51  ;;  %v182_v53 = vpop.f32.mrf.mxu2  ;;  %v281_v60 = vpop.f32.mrf.mxu1 }
  0xaf   :  { %v183_v56 = vadd.f32 %v182_v53, %v148_v54 }
  0xb0   :  { %v278_v55 = vadd.f32 %v277_v49, %v249_v52 }
  0xb2   :  { %284 = vst.msk [vmem:[#allocation7] sm:$0xff] %vm61_vm0, %v278_v55  ;;  %296 = vrot.lane.b32.xlu1 %v278_v55, %s509_s2  ;;  %288 = vrot.lane.b32.xlu0 %v278_v55, %s510_s30 }
  0xb3   :  { %v215_v57 = vpop.f32.mrf.mxu3 }
  0xb4   :  { %v216_v59 = vadd.f32 %v215_v57, %v183_v56 }
  0xb6   :  { %v253_v61 = vadd.f32 %v252_v58, %v216_v59 }
  0xb8   :  { %v282_v62 = vadd.f32 %v281_v60, %v253_v61 }
  0xba   :  { %285 = vst.msk [vmem:[#allocation7 + $0x8] sm:$0xff] %vm61_vm0, %v282_v62  ;;  %298 = vrot.lane.b32.xlu1 %v282_v62, %s509_s2  ;;  %290 = vrot.lane.b32.xlu0 %v282_v62, %s510_s30 }
  0xbb   :  { %316 = dma.vmem_to_hbm [thread:$0]  %s309_s7, 256, %s311_s10, [#allocation4], %s506_s26, %s506_s26, %s507_s27  }
 0x124   :  { %v297_v63 = vpop.permute.xlu1 %296  ;;  %v289_v0 = vpop.permute.xlu0 %288 }
 0x125   :  { %302 = vst.msk [vmem:[#allocation10] sm:$0xff] %vm61_vm0, %v297_v63 }
 0x126   :  { %294 = vst.msk [vmem:[#allocation8] sm:$0xff] %vm61_vm0, %v289_v0 }
 0x12c   :  { %v299_v1 = vpop.permute.xlu1 %298  ;;  %v291_v2 = vpop.permute.xlu0 %290 }
 0x12d   :  { %303 = vst.msk [vmem:[#allocation10 + $0x8] sm:$0xff] %vm61_vm0, %v299_v1 }
 0x12e   :  { %295 = vst.msk [vmem:[#allocation8 + $0x8] sm:$0xff] %vm61_vm0, %v291_v2 }
 0x12f   :  { %329 = dma.vmem_to_hbm [thread:$0]  %s322_s3, 256, %s324_s14, [#allocation9], %s506_s26, %s506_s26, %s507_s27  }
 0x130   :  { %342 = dma.vmem_to_hbm [thread:$0]  %s335_s16, 256, %s337_s19, [#allocation9], %s506_s26, %s506_s26, %s507_s27  }
 0x131   :  { %501 = dma.done.wait [#allocation4], 256  }
 0x132   :  { %502 = vsyncadd [#allocation4], 4294967040 }
 0x133   :  { %503 = dma.done.wait [#allocation9], 512  }
 0x134   :  { %504 = vsyncadd [#allocation9], 4294966784 }
 0x135   :  { %355 = vsyncpa [#allocation3], 1 }
 0x136   :  { %356 = vsyncpa [#allocation6], 1 }
 0x137   :  { %357 = vsyncpa [#allocation4], 1 }
 0x138   :  { %358 = vsyncpa [#allocation9], 1 }

</bundles_post_ra>
